<compile_context>
chip_gen: v6e
topology: v6e:2x2x1
jax: 0.10.0
libtpu: 0.0.40
codegen_flags: <defaults>
</compile_context>

<pallas_src>
import functools

import jax
import jax.numpy as jnp
from jax.experimental import pallas as pl
from jax.experimental.pallas import tpu as pltpu


def _rmsnorm_kernel(x_ref, w_ref, o_ref, *, eps: float):
    # Compute in float32 (matches the torch module's x.to(torch.float32)).
    x = x_ref[...].astype(jnp.float32)                     # (tile_rows, d_model)
    w = w_ref[...].astype(jnp.float32)                     # (1, d_model), VMEM-resident
    ms = jnp.mean(x * x, axis=-1, keepdims=True)           # (tile_rows, 1)
    inv = jax.lax.rsqrt(ms + eps)                          # EUP rsqrt: free under DMA time
    y = x * inv * w
    o_ref[...] = y.astype(o_ref.dtype)                     # cast back to input dtype


# Sublane alignment per element size (sub-32-bit dtypes pack along sublanes).
_SUBLANE_ALIGN = {4: 8, 2: 16, 1: 32}


def _vmem_budget():
    """Return (per-tile byte budget, vmem_limit_bytes) adapted to the chip."""
    try:
        cap = int(pltpu.get_tpu_info().vmem_capacity_bytes)
    except Exception:
        cap = 64 << 20  # conservative fallback (v7x per-TensorCore VMEM)
    vmem_limit = (cap * 3) // 4      # leave headroom for compiler internal scratch
    tile_budget = vmem_limit // 2    # leave headroom inside the scoped limit
    return tile_budget, vmem_limit


def _pick_tile_rows(rows: int, d_model: int, itemsize: int, budget_bytes: int):
    """Largest sublane-aligned tile_rows whose VMEM footprint fits the budget."""
    align = _SUBLANE_ALIGN.get(itemsize, 8)
    # Per-row VMEM bytes: 2x double-buffered input tile + 2x double-buffered
    # output tile in the input dtype, plus ~2 f32 temporaries in the body.
    per_row = d_model * (4 * itemsize + 2 * 4)
    tile_rows = max(align, (budget_bytes // per_row) // align * align)
    tile_rows = min(tile_rows, 1024)  # past the measured HBM-roofline plateau
    rows_aligned = -(-rows // align) * align
    tile_rows = min(tile_rows, rows_aligned)
    padded_rows = -(-rows // tile_rows) * tile_rows
    return tile_rows, padded_rows


def rmsnorm(x: jax.Array, weight: jax.Array, eps: float = 1e-5) -> jax.Array:
    """RMSNorm over the last axis of x, scaled by weight (shape (d_model,))."""
    orig_shape = x.shape
    d_model = orig_shape[-1]
    assert weight.shape == (d_model,)

    rows = 1
    for s in orig_shape[:-1]:
        rows *= s
    x2d = x.reshape(rows, d_model)
    w2d = weight.reshape(1, d_model)

    itemsize = jnp.dtype(x.dtype).itemsize
    tile_budget, vmem_limit = _vmem_budget()
    tile_rows, padded_rows = _pick_tile_rows(rows, d_model, itemsize, tile_budget)

    if padded_rows != rows:
        # Zero-pad: padded rows compute rsqrt(eps) * 0 = 0, no NaNs; sliced off below.
        x2d = jnp.pad(x2d, ((0, padded_rows - rows), (0, 0)))

    out = pl.pallas_call(
        functools.partial(_rmsnorm_kernel, eps=eps),
        out_shape=jax.ShapeDtypeStruct((padded_rows, d_model), x.dtype),
        grid_spec=pltpu.PrefetchScalarGridSpec(
            num_scalar_prefetch=0,
            grid=(padded_rows // tile_rows,),
            in_specs=[
                pl.BlockSpec((tile_rows, d_model), lambda i: (i, 0)),
                # Whole weight kept resident in VMEM: no per-step DMA/double buffer.
                pl.BlockSpec(memory_space=pltpu.MemorySpace.VMEM),
            ],
            out_specs=pl.BlockSpec((tile_rows, d_model), lambda i: (i, 0)),
        ),
        compiler_params=pltpu.CompilerParams(
            dimension_semantics=("parallel",),   # lets v7x shard rows across both TCs
            vmem_limit_bytes=vmem_limit,
        ),
    )(x2d, w2d)

    if padded_rows != rows:
        out = out[:rows]
    return out.reshape(orig_shape)


def _rmsnorm_ref(x, weight, eps):
    xf = x.astype(jnp.float32)
    inv = jax.lax.rsqrt(jnp.mean(xf * xf, axis=-1, keepdims=True) + eps)
    return (xf * inv * weight.astype(jnp.float32)).astype(x.dtype)


if __name__ == "__main__":
    key = jax.random.PRNGKey(0)
    k1, k2, k3, k4 = jax.random.split(key, 4)

    # --- primary check: matches the module's default init (weight = ones) ---
    batch, seq, d_model = 2, 8, 32
    x = jax.random.normal(k1, (batch, seq, d_model), dtype=jnp.float32)
    weight = jnp.ones((d_model,), dtype=jnp.float32)
    y = jax.block_until_ready(rmsnorm(x, weight, eps=1e-5))
    ref = _rmsnorm_ref(x, weight, 1e-5)
    assert jnp.allclose(y, ref, atol=1e-5, rtol=1e-5), "f32 mismatch vs reference"

    # --- rows not divisible by the tile (exercises the padding path) ---
    x_odd = jax.random.normal(k2, (3, 5, 128), dtype=jnp.float32)
    w_odd = jax.random.normal(k3, (128,), dtype=jnp.float32)
    y_odd = jax.block_until_ready(rmsnorm(x_odd, w_odd, eps=1e-5))
    ref_odd = _rmsnorm_ref(x_odd, w_odd, 1e-5)
    assert jnp.allclose(y_odd, ref_odd, atol=1e-5, rtol=1e-5), "padded-rows mismatch"

    # --- bf16 input (exercises the 16-row sublane alignment path) ---
    x_bf = jax.random.normal(k4, (2, 16, 256), dtype=jnp.bfloat16)
    w_bf = jnp.ones((256,), dtype=jnp.float32)
    y_bf = jax.block_until_ready(rmsnorm(x_bf, w_bf, eps=1e-5))
    ref_bf = _rmsnorm_ref(x_bf, w_bf, 1e-5)
    assert jnp.allclose(y_bf.astype(jnp.float32), ref_bf.astype(jnp.float32),
                        atol=1e-2, rtol=1e-2), "bf16 mismatch vs reference"

    print("KERNEL_OK")
</pallas_src>

<mosaic_0001>
module attributes {stable_mosaic.version = 11 : i64} {
  func.func @_rmsnorm_kernel(%arg0: i32, %arg1: memref<16x32xf32, #tpu.memory_space<vmem>>, %arg2: memref<1x32xf32, #tpu.memory_space<vmem>>, %arg3: memref<16x32xf32, #tpu.memory_space<vmem>>) attributes {dimension_semantics = [#tpu.dimension_semantics<parallel>], iteration_bounds = array<i64: 1>, scalar_prefetch = 0 : i64, scratch_operands = 0 : i64, tpu.core_type = #tpu.core_type<tc>, window_params = [{transform_indices = @transform_0, window_bounds = array<i64: 16, 32>}, {pipeline_mode = #tpu.pipeline_mode<synchronous>, transform_indices = @transform_1, window_bounds = array<i64: 1, 32>}, {transform_indices = @transform_2, window_bounds = array<i64: 16, 32>}]} {
    %c0 = arith.constant 0 : index
    %c0_0 = arith.constant 0 : index
    %0 = vector.load %arg1[%c0, %c0_0] : memref<16x32xf32, #tpu.memory_space<vmem>>, vector<16x32xf32>
    %c0_1 = arith.constant 0 : index
    %c0_2 = arith.constant 0 : index
    %1 = vector.load %arg2[%c0_1, %c0_2] : memref<1x32xf32, #tpu.memory_space<vmem>>, vector<1x32xf32>
    %2 = arith.mulf %0, %0 : vector<16x32xf32>
    %cst = arith.constant dense<0.000000e+00> : vector<16xf32>
    %3 = vector.multi_reduction <add>, %2, %cst [1] : vector<16x32xf32> to vector<16xf32>
    %4 = vector.shape_cast %3 : vector<16xf32> to vector<16x1xf32>
    %cst_3 = arith.constant 3.200000e+01 : f32
    %5 = vector.broadcast %cst_3 : f32 to vector<16x1xf32>
    %6 = arith.divf %4, %5 : vector<16x1xf32>
    %cst_4 = arith.constant 9.99999974E-6 : f32
    %7 = vector.broadcast %cst_4 : f32 to vector<16x1xf32>
    %8 = arith.addf %6, %7 : vector<16x1xf32>
    %9 = math.rsqrt %8 : vector<16x1xf32>
    %10 = vector.broadcast %9 : vector<16x1xf32> to vector<16x32xf32>
    %11 = arith.mulf %0, %10 : vector<16x32xf32>
    %12 = vector.broadcast %1 : vector<1x32xf32> to vector<16x32xf32>
    %13 = arith.mulf %11, %12 : vector<16x32xf32>
    %c0_5 = arith.constant 0 : index
    %c0_6 = arith.constant 0 : index
    %14 = vector.load %arg3[%c0_5, %c0_6] : memref<16x32xf32, #tpu.memory_space<vmem>>, vector<16x32xf32>
    tpu.vector_store %arg3[%c0_5, %c0_6], %13 {strides = array<i32>} : memref<16x32xf32, #tpu.memory_space<vmem>>, vector<16x32xf32>,
    return
  }
  func.func @transform_0(%arg0: i32) -> (i32, i32) {
    %c0_i32 = arith.constant 0 : i32
    %c0_i32_0 = arith.constant 0 : i32
    return %arg0, %c0_i32 : i32, i32
  }
  func.func @transform_1(%arg0: i32) -> (i32, i32) {
    %c0_i32 = arith.constant 0 : i32
    %c0_i32_0 = arith.constant 0 : i32
    %c0_i32_1 = arith.constant 0 : i32
    return %c0_i32, %c0_i32_0 : i32, i32
  }
  func.func @transform_2(%arg0: i32) -> (i32, i32) {
    %c0_i32 = arith.constant 0 : i32
    %c0_i32_0 = arith.constant 0 : i32
    return %arg0, %c0_i32 : i32, i32
  }
}

</mosaic_0001>

<bundles_post_ra>
// kernel: tpu_custom_call.1
= control target key start
LH: loop header
LB: loop body
LE: loop exit
PB: predicated region body
PF: predicated region fallthrough
CT: control target
= control target key end

     0   :  { %7 = vsyncpa [#allocation3], 0  ;;  %s165_s0 = inlined_call_operand.hbm [shape: f32[16,32], index: 0, kind: input, shape index: {}]   ;;  %s166_s1 = inlined_call_operand.vmem [shape: f32[1,32], index: 1, kind: input, shape index: {}]   ;;  %s167_s2 = inlined_call_operand.hbm [shape: f32[16,32], index: 2, kind: output, shape index: {}]  }
   0x1   :  { %8 = vsyncpa [#allocation4], 0  ;;  %s127_s9 = smov [#allocation2]  }
   0x2   :  { %s14_s10 = sshll.u32 %s127_s9, 4  ;;  %s15_s10 = int_to_ptr.vmem [resolvable:$true] %s14_s10 }
   0x3   :  { %s91_s11 = scalar_lea.vmem %s15_s10, 256  ;;  %p96_p1 = scmp.lt.s32.totalorder %s15_s10, %s15_s10 }
   0x4   :  { %p92_p0 = scmp.ne.s32.totalorder %s15_s10, %s91_s11  ;;  %p97_p2 = scmp.lt.s32.totalorder %s91_s11, %s91_s11 }
   0x6   :  { %p98_p3 = por %p97_p2, %p96_p1 }
   0x8   :  { %p99_p4 = pnand %p98_p3, %p92_p0 }
   0xa   :  { %102 = shalt.err (!%p99_p4)
}
   0xb   :  { %s128_s12 = smov 128   ;;  %s129_s13 = smov 8  }
   0xc   :  { %20 = dma.hbm_to_vmem [thread:$0]  %s165_s0, 256, %s15_s10, [#allocation3], %s128_s12, %s128_s12, %s129_s13  }
   0xd   :  { %123 = dma.done.wait [#allocation3], 256  }
   0xe   :  { %124 = vsyncadd [#allocation3], 4294967040  ;;  %v26_v0 = vld [vmem:[#allocation2] sm:$0xff]  ;;  %vm31_vm0 = vcmask 261120   ;;  %v27_v1 = vld [vmem:[#allocation2 + $0x8] sm:$0xff]  ;;  %s130_s17 = smov [#allocation5]  }
   0xf   :  { %v29_v2 = vmul.f32 %v26_v0, %v26_v0  ;;  %v30_v3 = vmul.f32 %v27_v1, %v27_v1  ;;  %v74_v13 = vld [vmem:[%s166_s1] ss:$0 sm:$0xff]  ;;  %s62_s18 = sshll.u32 %s130_s17, 4  ;;  %s63_s18 = int_to_ptr.vmem [resolvable:$true] %s62_s18 }
  0x10   :  { %s103_s19 = scalar_lea.vmem %s63_s18, 256  ;;  %p108_p6 = scmp.lt.s32.totalorder %s63_s18, %s63_s18 }
  0x11   :  { %v32_v4 = vsel %vm31_vm0, %v29_v2, 0.0  ;;  %v35_v5 = vsel %vm31_vm0, %v30_v3, 0.0  ;;  %p104_p5 = scmp.ne.s32.totalorder %s63_s18, %s103_s19  ;;  %p109_p7 = scmp.lt.s32.totalorder %s103_s19, %s103_s19 }
  0x12   :  { %33 = vadd.xlane.f32.xlu0 %v32_v4 }
  0x13   :  { %p110_p8 = por %p109_p7, %p108_p6 }
  0x15   :  { %p111_p9 = pnand %p110_p8, %p104_p5 }
  0x16   :  { %36 = vadd.xlane.f32.xlu0 %v35_v5 }
  0x9b   :  { %v34_v6 = vpop.xlane.xlu0 %33 }
  0x9c   :  { %v39_v7 = vmul.f32 0.03125, %v34_v6 }
  0x9e   :  { %v41_v8 = vadd.f32 1e-05, %v39_v7 }
  0x9f   :  { %v37_v9 = vpop.xlane.xlu0 %36 }
  0xa0   :  { %79 = vrsqrt.f32 %v41_v8  ;;  %v40_v10 = vmul.f32 0.03125, %v37_v9 }
  0xa2   :  { %v42_v11 = vadd.f32 1e-05, %v40_v10 }
  0xa4   :  { %81 = vrsqrt.f32 %v42_v11 }
  0xad   :  { %v80_v12 = vpop.eup %79 }
  0xae   :  { %v45_v14 = vmul.f32 %v80_v12, %v26_v0 }
  0xb0   :  { %v53_v15 = vmul.f32 %v74_v13, %v45_v14 }
  0xb1   :  { %v82_v16 = vpop.eup %81 }
  0xb2   :  { %v46_v17 = vmul.f32 %v82_v16, %v27_v1  ;;  %55 = vst.msk [vmem:[#allocation5] sm:$0xff] %vm31_vm0, %v53_v15 }
  0xb4   :  { %v54_v18 = vmul.f32 %v74_v13, %v46_v17 }
  0xb6   :  { %56 = vst.msk [vmem:[#allocation5 + $0x8] sm:$0xff] %vm31_vm0, %v54_v18 }
  0xb7   :  { %114 = shalt.err (!%p111_p9)
}
  0xb8   :  { %68 = dma.vmem_to_hbm [thread:$0]  %s63_s18, 256, %s167_s2, [#allocation4], %s128_s12, %s128_s12, %s129_s13  }
  0xb9   :  { %125 = dma.done.wait [#allocation4], 256  }
  0xba   :  { %126 = vsyncadd [#allocation4], 4294967040 }
  0xbb   :  { %72 = vsyncpa [#allocation3], 1 }
  0xbc   :  { %73 = vsyncpa [#allocation4], 1 }

</bundles_post_ra>
